<compile_context>
chip_gen: v7x
topology: tpu7x:2x2x1
jax: 0.10.0
libtpu: 0.0.40
codegen_flags: <defaults>
</compile_context>

<pallas_src>
import functools

import jax
import jax.numpy as jnp
from jax.experimental import pallas as pl
from jax.experimental.pallas import tpu as pltpu


def _round_up(x, m):
    return ((x + m - 1) // m) * m


# -----------------------------------------------------------------------------
# Chip detection / per-generation configuration
# -----------------------------------------------------------------------------
def _chip_generation():
    try:
        kind = jax.devices()[0].device_kind.lower()
    except Exception:
        return "other"
    if "v7" in kind:
        return "v7x"
    if "v6" in kind:
        return "v6e"
    if "v5e" in kind or "v5 lite" in kind or "v5lite" in kind:
        return "v5e"
    return "other"


_GEN_CFG = {
    #           bf16 default, scoped-VMEM budget, weight-tile target, big-M tile, 2 TCs
    "v7x":   dict(bf16=True,  vmem=28 << 20, wt_tile=1024, tm_big=512,  two_cores=True),
    "v6e":   dict(bf16=True,  vmem=96 << 20, wt_tile=1024, tm_big=1024, two_cores=False),
    "v5e":   dict(bf16=False, vmem=48 << 20, wt_tile=1024, tm_big=512,  two_cores=False),
    "other": dict(bf16=False, vmem=None,     wt_tile=512,  tm_big=512,  two_cores=False),
}


def _default_compute_dtype():
    return jnp.bfloat16 if _GEN_CFG[_chip_generation()]["bf16"] else jnp.float32


# -----------------------------------------------------------------------------
# Kernels
# -----------------------------------------------------------------------------
def _fc_kernel_single(x_ref, wt_ref, b_ref, o_ref, *, use_act):
    """K fits in one tile: fused dot + bias (+ReLU) straight into the output."""
    y = jnp.dot(x_ref[...], wt_ref[...], preferred_element_type=jnp.float32)
    y = y + b_ref[...]
    if use_act:
        y = jnp.maximum(y, 0.0)
    o_ref[...] = y.astype(o_ref.dtype)


def _fc_kernel_multi_f32out(x_ref, wt_ref, b_ref, o_ref, *, use_act):
    """K tiled, f32 output: accumulate directly into the k-resident o_ref."""
    k = pl.program_id(2)

    @pl.when(k == 0)
    def _():
        o_ref[...] = jnp.zeros_like(o_ref)

    o_ref[...] += jnp.dot(x_ref[...], wt_ref[...],
                          preferred_element_type=jnp.float32)

    @pl.when(k == pl.num_programs(2) - 1)
    def _():
        y = o_ref[...] + b_ref[...]
        if use_act:
            y = jnp.maximum(y, 0.0)
        o_ref[...] = y


def _fc_kernel_multi_scratch(x_ref, wt_ref, b_ref, o_ref, acc_ref, *, use_act):
    """K tiled, non-f32 output: f32 scratch accumulator, fused epilogue."""
    k = pl.program_id(2)

    @pl.when(k == 0)
    def _():
        acc_ref[...] = jnp.zeros_like(acc_ref)

    acc_ref[...] += jnp.dot(x_ref[...], wt_ref[...],
                            preferred_element_type=jnp.float32)

    @pl.when(k == pl.num_programs(2) - 1)
    def _():
        y = acc_ref[...] + b_ref[...]
        if use_act:
            y = jnp.maximum(y, 0.0)
        o_ref[...] = y.astype(o_ref.dtype)


# -----------------------------------------------------------------------------
# Tile planning
# -----------------------------------------------------------------------------
def _largest_aligned_divisor(aligned_dim, target, unit):
    """Largest multiple of `unit` <= target dividing aligned_dim.  Falls back to
    the full dim when only tiny divisors exist and the dim is modest."""
    assert aligned_dim % unit == 0
    t = max((min(target, aligned_dim) // unit) * unit, unit)
    while aligned_dim % t:
        t -= unit
    if t * 2 < target and aligned_dim <= 2 * target and aligned_dim <= 1536:
        return aligned_dim          # padding-free single tile, modest overshoot
    return t


def _plan_tiles(M, K_pad, N_pad, compute_dtype, out_dtype, gen):
    cfg = _GEN_CFG.get(gen, _GEN_CFG["other"])
    m_unit = 16 if compute_dtype == jnp.bfloat16 else 8
    M_aligned = _round_up(M, m_unit)

    if M_aligned <= 128:
        # Small batch: kernel is weight-HBM-bound.  Keep the whole batch in one
        # M tile; big weight tiles amortize the ~0.35us/step grid overhead.
        tm = M_aligned
        tn = _largest_aligned_divisor(N_pad, cfg["wt_tile"], 128)
        tk = _largest_aligned_divisor(K_pad, cfg["wt_tile"], 128)
    else:
        # Large M: bigger tm halves the dominant weight HBM stream (gm * |W|).
        tm = min(cfg["tm_big"], M_aligned)
        tn = _largest_aligned_divisor(N_pad, 512, 128)
        tk = _largest_aligned_divisor(K_pad, 512, 128)

    # v7x has two TensorCores: if the parallel (i, j) grid collapses to one
    # block, split the output-N axis (batch M is usually tiny) so both work.
    gm = -(-M // tm)
    gn = N_pad // tn
    if cfg["two_cores"] and gm * gn < 2 and tn % 256 == 0:
        tn //= 2
        gn = N_pad // tn

    gk = K_pad // tk
    cd_size = jnp.dtype(compute_dtype).itemsize
    out_size = jnp.dtype(out_dtype).itemsize

    # Deeper buffering on the weight stream only pays off for long K loops with
    # small blocks (big blocks already hide the per-step overhead).
    w_bufs = 3 if (gk >= 4 and tk * tn * cd_size < (4 << 20)) else 2

    footprint = (2 * tm * tk * cd_size          # x (double-buffered)
                 + w_bufs * tk * tn * cd_size   # weight stream
                 + 2 * tn * 4                   # bias
                 + 2 * tm * tn * out_size)      # output
    if gk > 1 and out_dtype != jnp.float32:
        footprint += tm * tn * 4                # f32 scratch accumulator

    vmem_limit = None
    if cfg["vmem"] is not None:
        vmem_limit = int(min(cfg["vmem"], footprint + (16 << 20)))
    return tm, tn, tk, w_bufs, vmem_limit


# -----------------------------------------------------------------------------
# Forward
# -----------------------------------------------------------------------------
def encoder_forward(x, params, *, use_act=True):
    """y = [ReLU](x @ W^T + b), with weight/bias pre-packed by *_encoder_params."""
    wt, bias = params["wt"], params["bias"]
    in_dim, out_dim = params["in_dim"], params["out_dim"]
    compute_dtype = wt.dtype

    M, K = x.shape
    assert K == in_dim, "in_dim mismatch"
    K_pad, N_pad = wt.shape            # padding derived from the STORED weight
    out_dtype = x.dtype

    gen = _chip_generation()
    tm, tn, tk, w_bufs, vmem_limit = _plan_tiles(
        M, K_pad, N_pad, compute_dtype, out_dtype, gen)

    if x.dtype != compute_dtype:
        x = x.astype(compute_dtype)
    M_pad = _round_up(M, tm)
    if (M_pad, K_pad) != (M, K):
        x = jnp.pad(x, ((0, M_pad - M), (0, K_pad - K)))

    gm, gn, gk = M_pad // tm, N_pad // tn, K_pad // tk

    cd_size = jnp.dtype(compute_dtype).itemsize
    out_size = jnp.dtype(out_dtype).itemsize
    cost = pl.CostEstimate(
        flops=2 * M_pad * N_pad * K_pad,
        bytes_accessed=(M_pad * K_pad * cd_size + K_pad * N_pad * cd_size
                        + N_pad * 4 + M_pad * N_pad * out_size),
        transcendentals=0,
    )

    if gk == 1:
        kernel = functools.partial(_fc_kernel_single, use_act=use_act)
        grid_spec = pltpu.PrefetchScalarGridSpec(
            num_scalar_prefetch=0,
            grid=(gm, gn),
            in_specs=[
                pl.BlockSpec((tm, tk), lambda i, j: (i, 0)),   # x tile
                pl.BlockSpec((tk, tn), lambda i, j: (0, j)),   # W^T tile
                pl.BlockSpec((1, tn), lambda i, j: (0, j)),    # bias tile
            ],
            out_specs=pl.BlockSpec((tm, tn), lambda i, j: (i, j)),
        )
        dims = ("parallel", "parallel")
    else:
        w_kwargs = {"pipeline_mode": pl.Buffered(w_bufs)} if w_bufs > 2 else {}
        in_specs = [
            pl.BlockSpec((tm, tk), lambda i, j, k: (i, k)),              # x
            pl.BlockSpec((tk, tn), lambda i, j, k: (k, j), **w_kwargs),  # W^T
            pl.BlockSpec((1, tn), lambda i, j, k: (0, j)),               # bias
        ]
        out_spec = pl.BlockSpec((tm, tn), lambda i, j, k: (i, j))
        if out_dtype == jnp.float32:
            kernel = functools.partial(_fc_kernel_multi_f32out, use_act=use_act)
            scratch = []
        else:
            kernel = functools.partial(_fc_kernel_multi_scratch, use_act=use_act)
            scratch = [pltpu.VMEM((tm, tn), jnp.float32)]
        grid_spec = pltpu.PrefetchScalarGridSpec(
            num_scalar_prefetch=0,
            grid=(gm, gn, gk),
            in_specs=in_specs,
            out_specs=out_spec,
            scratch_shapes=scratch,
        )
        dims = ("parallel", "parallel", "arbitrary")

    out = pl.pallas_call(
        kernel,
        out_shape=jax.ShapeDtypeStruct((M_pad, N_pad), out_dtype),
        grid_spec=grid_spec,
        compiler_params=pltpu.CompilerParams(
            dimension_semantics=dims,
            vmem_limit_bytes=vmem_limit,
        ),
        cost_estimate=cost,
    )(x, wt, bias)

    if (M_pad, N_pad) != (M, out_dim):
        out = out[:M, :out_dim]
    return out


# -----------------------------------------------------------------------------
# Param packing (done ONCE — never re-pad / re-cast / re-transpose per call)
# -----------------------------------------------------------------------------
def pack_encoder_params(weight, bias, *, compute_dtype=None):
    """Pack a torch-layout nn.Linear weight [out_dim, in_dim] + bias [out_dim]."""
    weight = jnp.asarray(weight)
    bias = jnp.asarray(bias)
    out_dim, in_dim = weight.shape
    if compute_dtype is None:
        compute_dtype = _default_compute_dtype()
    K_pad = _round_up(in_dim, 128)
    N_pad = _round_up(out_dim, 128)
    wt = weight.T.astype(compute_dtype)
    wt = jnp.pad(wt, ((0, K_pad - in_dim), (0, N_pad - out_dim)))
    b2 = bias.astype(jnp.float32).reshape(1, out_dim)
    b2 = jnp.pad(b2, ((0, 0), (0, N_pad - out_dim)))
    return {"wt": wt, "bias": b2, "in_dim": in_dim, "out_dim": out_dim}


def init_encoder_params(key, in_dim, out_dim, *, compute_dtype=None,
                        param_dtype=jnp.float32):
    """nn.Linear-style init U(-1/sqrt(in_dim), 1/sqrt(in_dim)), then pack."""
    kw, kb = jax.random.split(key)
    bound = 1.0 / (in_dim ** 0.5)
    w = jax.random.uniform(kw, (out_dim, in_dim), param_dtype, -bound, bound)
    b = jax.random.uniform(kb, (out_dim,), param_dtype, -bound, bound)
    return pack_encoder_params(w, b, compute_dtype=compute_dtype)


# -----------------------------------------------------------------------------
# Demo / validation
# -----------------------------------------------------------------------------
if __name__ == "__main__":
    key = jax.random.PRNGKey(0)
    kx, kp1, kp2, kp3 = jax.random.split(key, 4)

    # --- 1. tiny shape, chip-auto compute dtype, single-K fused path ---------
    # TODO(synk): at this size plain XLA dot is faster; exercised for validation.
    batch, in_dim, out_dim = 16, 64, 32
    x = jax.random.normal(kx, (batch, in_dim), jnp.float32)
    params = init_encoder_params(kp1, in_dim, out_dim)
    out = jax.block_until_ready(encoder_forward(x, params, use_act=True))
    cd = params["wt"].dtype
    w_f32 = params["wt"][:in_dim, :out_dim].astype(jnp.float32)
    b_f32 = params["bias"][0, :out_dim]
    ref = jnp.maximum(
        jnp.dot(x.astype(cd).astype(jnp.float32), w_f32,
                precision=jax.lax.Precision.HIGHEST) + b_f32, 0.0)
    assert out.shape == (batch, out_dim) and out.dtype == x.dtype
    assert jnp.allclose(out, ref, atol=1e-2, rtol=1e-2), "test-1 mismatch"

    # --- 2. f32 compute, K-tiled path (accumulate directly into o_ref) -------
    batch2, in2, out2 = 32, 2048, 256
    x2 = jax.random.normal(kx, (batch2, in2), jnp.float32) * 0.5
    params2 = init_encoder_params(kp2, in2, out2, compute_dtype=jnp.float32)
    got2 = jax.block_until_ready(encoder_forward(x2, params2, use_act=False))
    ref2 = jnp.dot(x2, params2["wt"][:in2, :out2],
                   precision=jax.lax.Precision.HIGHEST) + params2["bias"][0, :out2]
    assert jnp.allclose(got2, ref2, atol=5e-3, rtol=5e-3), "test-2 mismatch"

    # --- 3. bf16 in/out, K-tiled path (f32 scratch accumulator) --------------
    batch3, in3, out3 = 8, 2048, 384
    x3 = jax.random.normal(kx, (batch3, in3), jnp.float32).astype(jnp.bfloat16)
    params3 = init_encoder_params(kp3, in3, out3, compute_dtype=jnp.bfloat16)
    got3 = jax.block_until_ready(encoder_forward(x3, params3, use_act=True))
    assert got3.dtype == jnp.bfloat16 and got3.shape == (batch3, out3)
    ref3 = jnp.maximum(
        jnp.dot(x3.astype(jnp.float32),
                params3["wt"][:in3, :out3].astype(jnp.float32),
                precision=jax.lax.Precision.HIGHEST) + params3["bias"][0, :out3],
        0.0)
    assert jnp.allclose(got3.astype(jnp.float32), ref3, atol=3e-2, rtol=3e-2), \
        "test-3 mismatch"

    print("KERNEL_OK")
</pallas_src>

<mosaic_0001>
module attributes {stable_mosaic.version = 11 : i64} {
  func.func @_fc_kernel_single(%arg0: i32, %arg1: i32, %arg2: memref<16x128xf32, #tpu.memory_space<vmem>>, %arg3: memref<128x128xf32, #tpu.memory_space<vmem>>, %arg4: memref<1x128xf32, #tpu.memory_space<vmem>>, %arg5: memref<16x128xf32, #tpu.memory_space<vmem>>) attributes {dimension_semantics = [#tpu.dimension_semantics<parallel>, #tpu.dimension_semantics<parallel>], iteration_bounds = array<i64: 1, 1>, scalar_prefetch = 0 : i64, scratch_operands = 0 : i64, tpu.core_type = #tpu.core_type<tc>, window_params = [{transform_indices = @transform_0, window_bounds = array<i64: 16, 128>}, {transform_indices = @transform_1, window_bounds = array<i64: 128, 128>}, {transform_indices = @transform_2, window_bounds = array<i64: 1, 128>}, {transform_indices = @transform_3, window_bounds = array<i64: 16, 128>}]} {
    %c0 = arith.constant 0 : index
    %c0_0 = arith.constant 0 : index
    %0 = vector.load %arg2[%c0, %c0_0] : memref<16x128xf32, #tpu.memory_space<vmem>>, vector<16x128xf32>
    %c0_1 = arith.constant 0 : index
    %c0_2 = arith.constant 0 : index
    %1 = vector.load %arg3[%c0_1, %c0_2] : memref<128x128xf32, #tpu.memory_space<vmem>>, vector<128x128xf32>
    %cst = arith.constant dense<0.000000e+00> : vector<16x128xf32>
    %2 = tpu.matmul %0, %1, %cst {dimension_numbers = #tpu.dot_dimension_numbers<[1], [0], [0], [1], [0, 0, 1, 1], [], []>} : vector<16x128xf32>, vector<128x128xf32>, vector<16x128xf32> -> vector<16x128xf32>
    %c0_3 = arith.constant 0 : index
    %c0_4 = arith.constant 0 : index
    %3 = vector.load %arg4[%c0_3, %c0_4] : memref<1x128xf32, #tpu.memory_space<vmem>>, vector<1x128xf32>
    %4 = vector.broadcast %3 : vector<1x128xf32> to vector<16x128xf32>
    %5 = arith.addf %2, %4 : vector<16x128xf32>
    %cst_5 = arith.constant 0.000000e+00 : f32
    %6 = vector.broadcast %cst_5 : f32 to vector<16x128xf32>
    %7 = arith.maximumf %5, %6 : vector<16x128xf32>
    %c0_6 = arith.constant 0 : index
    %c0_7 = arith.constant 0 : index
    %8 = vector.load %arg5[%c0_6, %c0_7] : memref<16x128xf32, #tpu.memory_space<vmem>>, vector<16x128xf32>
    tpu.vector_store %arg5[%c0_6, %c0_7], %7 {strides = array<i32>} : memref<16x128xf32, #tpu.memory_space<vmem>>, vector<16x128xf32>,
    return
  }
  func.func @transform_0(%arg0: i32, %arg1: i32) -> (i32, i32) {
    %c0_i32 = arith.constant 0 : i32
    %c0_i32_0 = arith.constant 0 : i32
    return %arg0, %c0_i32 : i32, i32
  }
  func.func @transform_1(%arg0: i32, %arg1: i32) -> (i32, i32) {
    %c0_i32 = arith.constant 0 : i32
    %c0_i32_0 = arith.constant 0 : i32
    return %c0_i32, %arg1 : i32, i32
  }
  func.func @transform_2(%arg0: i32, %arg1: i32) -> (i32, i32) {
    %c0_i32 = arith.constant 0 : i32
    %c0_i32_0 = arith.constant 0 : i32
    return %c0_i32, %arg1 : i32, i32
  }
  func.func @transform_3(%arg0: i32, %arg1: i32) -> (i32, i32) {
    %c0_i32 = arith.constant 0 : i32
    return %arg0, %arg1 : i32, i32
  }
}

</mosaic_0001>

<bundles_post_ra>
// kernel: tpu_custom_call.1
= control target key start
LH: loop header
LB: loop body
LE: loop exit
PB: predicated region body
PF: predicated region fallthrough
CT: control target
= control target key end

     0   :  { %8 = vsyncpa [#allocation3], 0  ;;  %s401_s0 = inlined_call_operand.hbm [shape: f32[16,128], index: 0, kind: input, shape index: {}]   ;;  %s402_s1 = inlined_call_operand.hbm [shape: f32[128,128], index: 1, kind: input, shape index: {}]   ;;  %s403_s2 = inlined_call_operand.vmem [shape: f32[1,128], index: 2, kind: input, shape index: {}]   ;;  %s404_s3 = inlined_call_operand.hbm [shape: f32[16,128], index: 3, kind: output, shape index: {}]  }
   0x1   :  { %9 = vsyncpa [#allocation6], 0 }
   0x2   :  { %10 = vsyncpa [#allocation4], 0  ;;  %s328_s12 = smov [#allocation2]   ;;  %s256_s16 = scalar_lea.hbm %s401_s0, 256 }
   0x3   :  { %s16_s13 = sshll.u32 %s328_s12, 4  ;;  %p257_p0 = scmp.ne.s32.totalorder %s401_s0, %s256_s16  ;;  %s17_s13 = int_to_ptr.vmem [resolvable:$true] %s16_s13 }
   0x4   :  { %p260_p1 = scmp.lt.u32.totalorder %s256_s16, %s401_s0 }
   0x6   :  { %p262_p2 = pnand %p260_p1, %p257_p0 }
   0x8   :  { %265 = shalt.err (!%p262_p2)
}
   0x9   :  { %s266_s21 = scalar_lea.vmem %s17_s13, 256  ;;  %p271_p4 = scmp.lt.s32.totalorder %s17_s13, %s17_s13 }
   0xa   :  { %p267_p3 = scmp.ne.s32.totalorder %s17_s13, %s266_s21  ;;  %p272_p5 = scmp.lt.s32.totalorder %s266_s21, %s266_s21 }
   0xc   :  { %p273_p6 = por %p272_p5, %p271_p4 }
   0xe   :  { %p274_p7 = pnand %p273_p6, %p267_p3 }
  0x10   :  { %277 = shalt.err (!%p274_p7)
}
  0x11   :  { %s329_s22 = smov 128   ;;  %s330_s23 = smov 8  }
  0x12   :  { %22 = dma.hbm_to_vmem [thread:$0]  %s401_s0, 256, %s17_s13, [#allocation3], %s329_s22, %s329_s22, %s330_s23  }
  0x13   :  { %s331_s26 = smov [#allocation5]   ;;  %s278_s30 = scalar_lea.hbm %s402_s1, 2048 }
  0x14   :  { %s28_s27 = sshll.u32 %s331_s26, 4  ;;  %p279_p8 = scmp.ne.s32.totalorder %s402_s1, %s278_s30  ;;  %s29_s27 = int_to_ptr.vmem [resolvable:$true] %s28_s27 }
  0x15   :  { %p282_p9 = scmp.lt.u32.totalorder %s278_s30, %s402_s1 }
  0x17   :  { %p284_p10 = pnand %p282_p9, %p279_p8 }
  0x19   :  { %287 = shalt.err (!%p284_p10)
}
  0x1a   :  { %s288_s8 = scalar_lea.vmem %s29_s27, 2048  ;;  %p293_p12 = scmp.lt.s32.totalorder %s29_s27, %s29_s27 }
  0x1b   :  { %p289_p11 = scmp.ne.s32.totalorder %s29_s27, %s288_s8  ;;  %p294_p13 = scmp.lt.s32.totalorder %s288_s8, %s288_s8 }
  0x1d   :  { %p295_p0 = por %p294_p13, %p293_p12 }
  0x1f   :  { %p296_p1 = pnand %p295_p0, %p289_p11 }
  0x21   :  { %299 = shalt.err (!%p296_p1)
}
  0x22   :  { %34 = dma.hbm_to_vmem [thread:$0]  %s402_s1, 2048, %s29_s27, [#allocation6], %s329_s22, %s329_s22, %s330_s23  }
  0x23   :  { %322 = dma.done.wait [#allocation3], 256  }
  0x24   :  { %323 = vsyncadd [#allocation3], 4294967040 }
  0x25   :  { %324 = dma.done.wait [#allocation6], 2048  }
  0x26   :  { %325 = vsyncadd [#allocation6], 4294965248  ;;  %v45_v0 = vld [vmem:[#allocation5] sm:$0xff]  ;;  %v46_v1 = vld [vmem:[#allocation5 + $0x8] sm:$0xff]  ;;  %s332_s11 = smov [#allocation7]  }
  0x27   :  { %v47_v2 = vld [vmem:[#allocation5 + $0x10] sm:$0xff]  ;;  %v219_v3 = vpack.c.bf16 %v46_v1, %v45_v0  ;;  %v48_v4 = vld [vmem:[#allocation5 + $0x18] sm:$0xff]  ;;  %v49_v6 = vld [vmem:[#allocation5 + $0x20] sm:$0xff]  ;;  %s152_s12 = sshll.u32 %s332_s11, 4  ;;  %s153_s12 = int_to_ptr.vmem [resolvable:$true] %s152_s12 }
  0x28   :  { %v223_v5 = vpack.c.bf16 %v48_v4, %v47_v2  ;;  %v50_v7 = vld [vmem:[#allocation5 + $0x28] sm:$0xff]  ;;  %v43_v9 = vld [vmem:[#allocation2] sm:$0xff]  ;;  %v52_v11 = vld [vmem:[#allocation5 + $0x38] sm:$0xff]  ;;  %s300_s13 = scalar_lea.vmem %s153_s12, 256  ;;  %p305_p3 = scmp.lt.s32.totalorder %s153_s12, %s153_s12 }
  0x29   :  { %220 = vmatprep.subr.bf16.mxu0 %v219_v3  ;;  %v227_v8 = vpack.c.bf16 %v50_v7, %v49_v6  ;;  %v51_v10 = vld [vmem:[#allocation5 + $0x30] sm:$0xff]  ;;  %216 = vmatprep.mubr.f32.mxu0 %v43_v9  ;;  %v53_v13 = vld [vmem:[#allocation5 + $0x40] sm:$0xff]  ;;  %v54_v14 = vld [vmem:[#allocation5 + $0x48] sm:$0xff]  ;;  %p301_p2 = scmp.ne.s32.totalorder %s153_s12, %s300_s13  ;;  %p306_p4 = scmp.lt.s32.totalorder %s300_s13, %s300_s13 }
  0x2a   :  { %222 = vmatpush3.bf16.msra.mxu0 %v219_v3  ;;  %v231_v12 = vpack.c.bf16 %v52_v11, %v51_v10  ;;  %v235_v15 = vpack.c.bf16 %v54_v14, %v53_v13  ;;  %v55_v16 = vld [vmem:[#allocation5 + $0x50] sm:$0xff]  ;;  %v56_v17 = vld [vmem:[#allocation5 + $0x58] sm:$0xff]  ;;  %v57_v19 = vld [vmem:[#allocation5 + $0x60] sm:$0xff] }
  0x2b   :  { %224 = vmatprep.subr.bf16.mxu0 %v223_v5  ;;  %v239_v18 = vpack.c.bf16 %v56_v17, %v55_v16  ;;  %v58_v20 = vld [vmem:[#allocation5 + $0x68] sm:$0xff]  ;;  %v59_v22 = vld [vmem:[#allocation5 + $0x70] sm:$0xff]  ;;  %v60_v23 = vld [vmem:[#allocation5 + $0x78] sm:$0xff]  ;;  %p307_p5 = por %p306_p4, %p305_p3 }
  0x2c   :  { %v243_v21 = vpack.c.bf16 %v58_v20, %v57_v19  ;;  %v247_v24 = vpack.c.bf16 %v60_v23, %v59_v22  ;;  %v44_v25 = vld [vmem:[#allocation2 + $0x8] sm:$0xff]  ;;  %v165_v26 = vld [vmem:[%s403_s2] ss:$0 sm:$0xff] }
  0x2d   :  { %p308_p6 = pnand %p307_p5, %p301_p2 }
  0x2e   :  { %226 = vmatpush3.bf16.msra.mxu0 %v223_v5 }
  0x2f   :  { %228 = vmatprep.subr.bf16.mxu0 %v227_v8 }
  0x32   :  { %230 = vmatpush3.bf16.msra.mxu0 %v227_v8 }
  0x33   :  { %232 = vmatprep.subr.bf16.mxu0 %v231_v12 }
  0x36   :  { %234 = vmatpush3.bf16.msra.mxu0 %v231_v12 }
  0x37   :  { %236 = vmatprep.subr.bf16.mxu0 %v235_v15 }
  0x3a   :  { %238 = vmatpush3.bf16.msra.mxu0 %v235_v15 }
  0x3b   :  { %240 = vmatprep.subr.bf16.mxu0 %v239_v18 }
  0x3e   :  { %242 = vmatpush3.bf16.msra.mxu0 %v239_v18 }
  0x3f   :  { %244 = vmatprep.subr.bf16.mxu0 %v243_v21 }
  0x42   :  { %246 = vmatpush3.bf16.msra.mxu0 %v243_v21 }
  0x43   :  { %248 = vmatprep.subr.bf16.mxu0 %v247_v24 }
  0x46   :  { %250 = vmatpush3.bf16.msra.mxu0 %v247_v24 }
  0x49   :  { %217 = vmatmul.mubr.f32.vlgmr.msra.gmra.mrb[0].mxu0 %v44_v25 }
 0x11c   :  { %v218_v27 = vpop.f32.mrb[0].mxu0 }
 0x11d   :  { %v140_v28 = vadd.f32 %v218_v27, %v165_v26  ;;  %v134_v29 = vpop.f32.mrb[1].mxu0 }
 0x11e   :  { %v135_v30 = vadd.f32 %v165_v26, %v134_v29 }
 0x11f   :  { %v144_v31 = vmax.f32 %v140_v28, 0.0 }
 0x120   :  { %v143_v32 = vmax.f32 %v135_v30, 0.0 }
 0x121   :  { %146 = vst [vmem:[#allocation7 + $0x8] sm:$0xff] %v144_v31 }
 0x122   :  { %145 = vst [vmem:[#allocation7] sm:$0xff] %v143_v32 }
 0x123   :  { %311 = shalt.err (!%p308_p6)
}
 0x124   :  { %s312_s15 = scalar_lea.hbm %s404_s3, 256 }
 0x125   :  { %p313_p7 = scmp.ne.s32.totalorder %s404_s3, %s312_s15  ;;  %p316_p8 = scmp.lt.u32.totalorder %s312_s15, %s404_s3 }
 0x127   :  { %p318_p9 = pnand %p316_p8, %p313_p7 }
 0x129   :  { %321 = shalt.err (!%p318_p9)
}
 0x12a   :  { %158 = dma.vmem_to_hbm [thread:$0]  %s153_s12, 256, %s404_s3, [#allocation4], %s329_s22, %s329_s22, %s330_s23  }
 0x12b   :  { %326 = dma.done.wait [#allocation4], 256  }
 0x12c   :  { %327 = vsyncadd [#allocation4], 4294967040 }
 0x12d   :  { %162 = vsyncpa [#allocation3], 1 }
 0x12e   :  { %163 = vsyncpa [#allocation6], 1 }
 0x12f   :  { %164 = vsyncpa [#allocation4], 1 }

</bundles_post_ra>
